<compile_context>
chip_gen: v7x
topology: tpu7x:2x2x1
jax: 0.10.0
libtpu: 0.0.40
codegen_flags: <defaults>
</compile_context>

<pallas_src>
import functools

import jax
import jax.numpy as jnp
from jax.experimental import pallas as pl
from jax.experimental.pallas import tpu as pltpu

BN_EPS = 1e-5


def _round_up(n, m):
    return ((n + m - 1) // m) * m


def _pad_to(a, shape):
    pads = [(0, s - d) for d, s in zip(a.shape, shape)]
    return jnp.pad(a, pads)


def classifier_kernel(x_ref,
                      w1_ref, b1_ref, g1_ref, be1_ref,
                      w2_ref, b2_ref, g2_ref, be2_ref,
                      w3_ref, b3_ref,
                      o_ref):
    # fc1 + ReLU  (bf16 operands, f32 accumulation on the MXU)
    h = jnp.dot(x_ref[...], w1_ref[...],
                preferred_element_type=jnp.float32) + b1_ref[...]
    h = jnp.maximum(h, 0.0)

    # BatchNorm1d #1 (training mode, full-batch stats, two-pass variance,
    # gamma folded into a single per-feature scale)
    mean1 = jnp.mean(h, axis=0, keepdims=True)
    d1 = h - mean1
    var1 = jnp.mean(d1 * d1, axis=0, keepdims=True)
    s1 = g1_ref[...] * jax.lax.rsqrt(var1 + BN_EPS)
    h = d1 * s1 + be1_ref[...]

    # fc2 + ReLU
    h = jnp.dot(h.astype(jnp.bfloat16), w2_ref[...],
                preferred_element_type=jnp.float32) + b2_ref[...]
    h = jnp.maximum(h, 0.0)

    # BatchNorm1d #2
    mean2 = jnp.mean(h, axis=0, keepdims=True)
    d2 = h - mean2
    var2 = jnp.mean(d2 * d2, axis=0, keepdims=True)
    s2 = g2_ref[...] * jax.lax.rsqrt(var2 + BN_EPS)
    h = d2 * s2 + be2_ref[...]

    # fc3 (no activation); bias folded into the (lane-dense) final store
    o_ref[...] = jnp.dot(h.astype(jnp.bfloat16), w3_ref[...],
                         preferred_element_type=jnp.float32) + b3_ref[...]


def prepare_params(params):
    """One-time padding + bf16 cast of the parameters (hoisted out of the
    per-call forward path).  Returns (padded_pytree, static_meta)."""
    in_dim, hidden = params["w1"].shape
    out_dim = params["w3"].shape[1]
    Ip = _round_up(in_dim, 128)
    Hp = _round_up(hidden, 128)
    Op = _round_up(out_dim, 128)

    padded = {
        # Matmul operands in bf16; bias / BN params stay f32.
        "w1": _pad_to(params["w1"], (Ip, Hp)).astype(jnp.bfloat16),
        "w2": _pad_to(params["w2"], (Hp, Hp)).astype(jnp.bfloat16),
        "w3": _pad_to(params["w3"], (Hp, Op)).astype(jnp.bfloat16),
        "b1": _pad_to(params["b1"], (1, Hp)),
        "g1": _pad_to(params["g1"], (1, Hp)),
        "be1": _pad_to(params["be1"], (1, Hp)),
        "b2": _pad_to(params["b2"], (1, Hp)),
        "g2": _pad_to(params["g2"], (1, Hp)),
        "be2": _pad_to(params["be2"], (1, Hp)),
        "b3": _pad_to(params["b3"], (1, Op)),
    }
    # Materialize once so no pad/cast op is replayed per forward call.
    padded = jax.tree_util.tree_map(jnp.asarray, padded)
    meta = dict(in_pad=Ip, out_dim=out_dim, out_pad=Op)
    return padded, meta


@functools.partial(jax.jit, static_argnames=("in_pad", "out_dim", "out_pad"))
def classifier_forward(x, padded_params, *, in_pad, out_dim, out_pad):
    """x: [B, input_dim] float32.  padded_params: output of prepare_params."""
    B = x.shape[0]
    pp = padded_params

    # Only the activation is padded / cast per call; weights are pre-padded.
    x_p = _pad_to(x, (B, in_pad)).astype(jnp.bfloat16)

    args = (x_p,
            pp["w1"], pp["b1"], pp["g1"], pp["be1"],
            pp["w2"], pp["b2"], pp["g2"], pp["be2"],
            pp["w3"], pp["b3"])

    # Small problem: everything fits in VMEM, so run the whole fused MLP in a
    # single invocation (full-array blocks, no grid).  Batch is NOT padded so
    # BN statistics are exactly the full-batch statistics.
    out_p = pl.pallas_call(
        classifier_kernel,
        out_shape=jax.ShapeDtypeStruct((B, out_pad), jnp.float32),
        in_specs=[pl.BlockSpec(memory_space=pltpu.MemorySpace.VMEM)] * len(args),
        out_specs=pl.BlockSpec(memory_space=pltpu.MemorySpace.VMEM),
    )(*args)
    return out_p[:, :out_dim]


def init_params(key, input_dim, hidden_dim, output_dim):
    ks = jax.random.split(key, 6)
    scale1 = 1.0 / jnp.sqrt(input_dim)
    scale2 = 1.0 / jnp.sqrt(hidden_dim)
    params = {
        # Linear weights stored as (in_dim, out_dim) == PyTorch weight.T
        "w1": jax.random.uniform(ks[0], (input_dim, hidden_dim), jnp.float32,
                                 -scale1, scale1),
        "b1": jax.random.uniform(ks[1], (1, hidden_dim), jnp.float32,
                                 -scale1, scale1),
        "w2": jax.random.uniform(ks[2], (hidden_dim, hidden_dim), jnp.float32,
                                 -scale2, scale2),
        "b2": jax.random.uniform(ks[3], (1, hidden_dim), jnp.float32,
                                 -scale2, scale2),
        "w3": jax.random.uniform(ks[4], (hidden_dim, output_dim), jnp.float32,
                                 -scale2, scale2),
        "b3": jax.random.uniform(ks[5], (1, output_dim), jnp.float32,
                                 -scale2, scale2),
        # BatchNorm affine params: weight=1, bias=0 (PyTorch default)
        "g1": jnp.ones((1, hidden_dim), jnp.float32),
        "be1": jnp.zeros((1, hidden_dim), jnp.float32),
        "g2": jnp.ones((1, hidden_dim), jnp.float32),
        "be2": jnp.zeros((1, hidden_dim), jnp.float32),
    }
    return params


def reference_forward(x, p):
    """Pure-JAX reference using the same bf16-operand / f32-accum matmuls."""
    def dot(a, b):
        return jnp.dot(a.astype(jnp.bfloat16), b.astype(jnp.bfloat16),
                       preferred_element_type=jnp.float32)

    h = jnp.maximum(dot(x, p["w1"]) + p["b1"], 0.0)
    m = h.mean(0, keepdims=True)
    v = ((h - m) ** 2).mean(0, keepdims=True)
    h = p["g1"] * (h - m) / jnp.sqrt(v + BN_EPS) + p["be1"]

    h = jnp.maximum(dot(h, p["w2"]) + p["b2"], 0.0)
    m = h.mean(0, keepdims=True)
    v = ((h - m) ** 2).mean(0, keepdims=True)
    h = p["g2"] * (h - m) / jnp.sqrt(v + BN_EPS) + p["be2"]

    return dot(h, p["w3"]) + p["b3"]


if __name__ == "__main__":
    B, input_dim, hidden_dim, output_dim = 8, 32, 32, 8

    key = jax.random.PRNGKey(0)
    kx, kp = jax.random.split(key)
    x = jax.random.normal(kx, (B, input_dim), jnp.float32)
    params = init_params(kp, input_dim, hidden_dim, output_dim)

    # One-time parameter padding / casting (hoisted out of the forward path).
    padded_params, meta = prepare_params(params)
    padded_params = jax.block_until_ready(padded_params)

    out = classifier_forward(x, padded_params, **meta)
    out = jax.block_until_ready(out)

    ref = reference_forward(x, params)
    assert out.shape == (B, output_dim)
    assert jnp.allclose(out, ref, atol=2e-3, rtol=2e-3), "mismatch vs reference"

    print("KERNEL_OK")
</pallas_src>

<mosaic_0001>
module attributes {stable_mosaic.version = 11 : i64} {
  func.func @classifier_kernel(%arg0: memref<8x128xbf16, #tpu.memory_space<vmem>>, %arg1: memref<128x128xbf16, #tpu.memory_space<vmem>>, %arg2: memref<1x128xf32, #tpu.memory_space<vmem>>, %arg3: memref<1x128xf32, #tpu.memory_space<vmem>>, %arg4: memref<1x128xf32, #tpu.memory_space<vmem>>, %arg5: memref<128x128xbf16, #tpu.memory_space<vmem>>, %arg6: memref<1x128xf32, #tpu.memory_space<vmem>>, %arg7: memref<1x128xf32, #tpu.memory_space<vmem>>, %arg8: memref<1x128xf32, #tpu.memory_space<vmem>>, %arg9: memref<128x128xbf16, #tpu.memory_space<vmem>>, %arg10: memref<1x128xf32, #tpu.memory_space<vmem>>, %arg11: memref<8x128xf32, #tpu.memory_space<vmem>>) attributes {dimension_semantics = [], scalar_prefetch = 0 : i64, scratch_operands = 0 : i64, tpu.core_type = #tpu.core_type<tc>} {
    %c0 = arith.constant 0 : index
    %c0_0 = arith.constant 0 : index
    %0 = vector.load %arg0[%c0, %c0_0] : memref<8x128xbf16, #tpu.memory_space<vmem>>, vector<8x128xbf16>
    %c0_1 = arith.constant 0 : index
    %c0_2 = arith.constant 0 : index
    %1 = vector.load %arg1[%c0_1, %c0_2] : memref<128x128xbf16, #tpu.memory_space<vmem>>, vector<128x128xbf16>
    %cst = arith.constant dense<0.000000e+00> : vector<8x128xf32>
    %2 = tpu.matmul %0, %1, %cst {dimension_numbers = #tpu.dot_dimension_numbers<[1], [0], [0], [1], [0, 0, 1, 1], [], []>} : vector<8x128xbf16>, vector<128x128xbf16>, vector<8x128xf32> -> vector<8x128xf32>
    %c0_3 = arith.constant 0 : index
    %c0_4 = arith.constant 0 : index
    %3 = vector.load %arg2[%c0_3, %c0_4] : memref<1x128xf32, #tpu.memory_space<vmem>>, vector<1x128xf32>
    %4 = vector.broadcast %3 : vector<1x128xf32> to vector<8x128xf32>
    %5 = arith.addf %2, %4 : vector<8x128xf32>
    %cst_5 = arith.constant 0.000000e+00 : f32
    %6 = vector.broadcast %cst_5 : f32 to vector<8x128xf32>
    %7 = arith.maximumf %5, %6 : vector<8x128xf32>
    %cst_6 = arith.constant dense<0.000000e+00> : vector<128xf32>
    %8 = vector.multi_reduction <add>, %7, %cst_6 [0] : vector<8x128xf32> to vector<128xf32>
    %9 = vector.shape_cast %8 : vector<128xf32> to vector<1x128xf32>
    %cst_7 = arith.constant 8.000000e+00 : f32
    %10 = vector.broadcast %cst_7 : f32 to vector<1x128xf32>
    %11 = arith.divf %9, %10 : vector<1x128xf32>
    %12 = vector.broadcast %11 : vector<1x128xf32> to vector<8x128xf32>
    %13 = arith.subf %7, %12 : vector<8x128xf32>
    %14 = arith.mulf %13, %13 : vector<8x128xf32>
    %cst_8 = arith.constant dense<0.000000e+00> : vector<128xf32>
    %15 = vector.multi_reduction <add>, %14, %cst_8 [0] : vector<8x128xf32> to vector<128xf32>
    %16 = vector.shape_cast %15 : vector<128xf32> to vector<1x128xf32>
    %cst_9 = arith.constant 8.000000e+00 : f32
    %17 = vector.broadcast %cst_9 : f32 to vector<1x128xf32>
    %18 = arith.divf %16, %17 : vector<1x128xf32>
    %c0_10 = arith.constant 0 : index
    %c0_11 = arith.constant 0 : index
    %19 = vector.load %arg3[%c0_10, %c0_11] : memref<1x128xf32, #tpu.memory_space<vmem>>, vector<1x128xf32>
    %cst_12 = arith.constant 9.99999974E-6 : f32
    %20 = vector.broadcast %cst_12 : f32 to vector<1x128xf32>
    %21 = arith.addf %18, %20 : vector<1x128xf32>
    %22 = math.rsqrt %21 : vector<1x128xf32>
    %23 = arith.mulf %19, %22 : vector<1x128xf32>
    %24 = vector.broadcast %23 : vector<1x128xf32> to vector<8x128xf32>
    %25 = arith.mulf %13, %24 : vector<8x128xf32>
    %c0_13 = arith.constant 0 : index
    %c0_14 = arith.constant 0 : index
    %26 = vector.load %arg4[%c0_13, %c0_14] : memref<1x128xf32, #tpu.memory_space<vmem>>, vector<1x128xf32>
    %27 = vector.broadcast %26 : vector<1x128xf32> to vector<8x128xf32>
    %28 = arith.addf %25, %27 : vector<8x128xf32>
    %29 = arith.truncf %28 : vector<8x128xf32> to vector<8x128xbf16>
    %c0_15 = arith.constant 0 : index
    %c0_16 = arith.constant 0 : index
    %30 = vector.load %arg5[%c0_15, %c0_16] : memref<128x128xbf16, #tpu.memory_space<vmem>>, vector<128x128xbf16>
    %cst_17 = arith.constant dense<0.000000e+00> : vector<8x128xf32>
    %31 = tpu.matmul %29, %30, %cst_17 {dimension_numbers = #tpu.dot_dimension_numbers<[1], [0], [0], [1], [0, 0, 1, 1], [], []>} : vector<8x128xbf16>, vector<128x128xbf16>, vector<8x128xf32> -> vector<8x128xf32>
    %c0_18 = arith.constant 0 : index
    %c0_19 = arith.constant 0 : index
    %32 = vector.load %arg6[%c0_18, %c0_19] : memref<1x128xf32, #tpu.memory_space<vmem>>, vector<1x128xf32>
    %33 = vector.broadcast %32 : vector<1x128xf32> to vector<8x128xf32>
    %34 = arith.addf %31, %33 : vector<8x128xf32>
    %cst_20 = arith.constant 0.000000e+00 : f32
    %35 = vector.broadcast %cst_20 : f32 to vector<8x128xf32>
    %36 = arith.maximumf %34, %35 : vector<8x128xf32>
    %cst_21 = arith.constant dense<0.000000e+00> : vector<128xf32>
    %37 = vector.multi_reduction <add>, %36, %cst_21 [0] : vector<8x128xf32> to vector<128xf32>
    %38 = vector.shape_cast %37 : vector<128xf32> to vector<1x128xf32>
    %cst_22 = arith.constant 8.000000e+00 : f32
    %39 = vector.broadcast %cst_22 : f32 to vector<1x128xf32>
    %40 = arith.divf %38, %39 : vector<1x128xf32>
    %41 = vector.broadcast %40 : vector<1x128xf32> to vector<8x128xf32>
    %42 = arith.subf %36, %41 : vector<8x128xf32>
    %43 = arith.mulf %42, %42 : vector<8x128xf32>
    %cst_23 = arith.constant dense<0.000000e+00> : vector<128xf32>
    %44 = vector.multi_reduction <add>, %43, %cst_23 [0] : vector<8x128xf32> to vector<128xf32>
    %45 = vector.shape_cast %44 : vector<128xf32> to vector<1x128xf32>
    %cst_24 = arith.constant 8.000000e+00 : f32
    %46 = vector.broadcast %cst_24 : f32 to vector<1x128xf32>
    %47 = arith.divf %45, %46 : vector<1x128xf32>
    %c0_25 = arith.constant 0 : index
    %c0_26 = arith.constant 0 : index
    %48 = vector.load %arg7[%c0_25, %c0_26] : memref<1x128xf32, #tpu.memory_space<vmem>>, vector<1x128xf32>
    %cst_27 = arith.constant 9.99999974E-6 : f32
    %49 = vector.broadcast %cst_27 : f32 to vector<1x128xf32>
    %50 = arith.addf %47, %49 : vector<1x128xf32>
    %51 = math.rsqrt %50 : vector<1x128xf32>
    %52 = arith.mulf %48, %51 : vector<1x128xf32>
    %53 = vector.broadcast %52 : vector<1x128xf32> to vector<8x128xf32>
    %54 = arith.mulf %42, %53 : vector<8x128xf32>
    %c0_28 = arith.constant 0 : index
    %c0_29 = arith.constant 0 : index
    %55 = vector.load %arg8[%c0_28, %c0_29] : memref<1x128xf32, #tpu.memory_space<vmem>>, vector<1x128xf32>
    %56 = vector.broadcast %55 : vector<1x128xf32> to vector<8x128xf32>
    %57 = arith.addf %54, %56 : vector<8x128xf32>
    %58 = arith.truncf %57 : vector<8x128xf32> to vector<8x128xbf16>
    %c0_30 = arith.constant 0 : index
    %c0_31 = arith.constant 0 : index
    %59 = vector.load %arg9[%c0_30, %c0_31] : memref<128x128xbf16, #tpu.memory_space<vmem>>, vector<128x128xbf16>
    %cst_32 = arith.constant dense<0.000000e+00> : vector<8x128xf32>
    %60 = tpu.matmul %58, %59, %cst_32 {dimension_numbers = #tpu.dot_dimension_numbers<[1], [0], [0], [1], [0, 0, 1, 1], [], []>} : vector<8x128xbf16>, vector<128x128xbf16>, vector<8x128xf32> -> vector<8x128xf32>
    %c0_33 = arith.constant 0 : index
    %c0_34 = arith.constant 0 : index
    %61 = vector.load %arg10[%c0_33, %c0_34] : memref<1x128xf32, #tpu.memory_space<vmem>>, vector<1x128xf32>
    %62 = vector.broadcast %61 : vector<1x128xf32> to vector<8x128xf32>
    %63 = arith.addf %60, %62 : vector<8x128xf32>
    %c0_35 = arith.constant 0 : index
    %c0_36 = arith.constant 0 : index
    %64 = vector.load %arg11[%c0_35, %c0_36] : memref<8x128xf32, #tpu.memory_space<vmem>>, vector<8x128xf32>
    tpu.vector_store %arg11[%c0_35, %c0_36], %63 {strides = array<i32>} : memref<8x128xf32, #tpu.memory_space<vmem>>, vector<8x128xf32>,
    return
  }
}

</mosaic_0001>

<bundles_post_ra>
// kernel: classifier_forward.1
= control target key start
LH: loop header
LB: loop body
LE: loop exit
PB: predicated region body
PF: predicated region fallthrough
CT: control target
= control target key end

     0   :  { %16 = vsyncpa [#allocation3], 0  ;;  %s942_s0 = inlined_call_operand.vmem [shape: bf16[8,128], index: 0, kind: input, shape index: {}]   ;;  %s943_s1 = inlined_call_operand.hbm [shape: bf16[128,128], index: 1, kind: input, shape index: {}]   ;;  %s944_s2 = inlined_call_operand.vmem [shape: f32[1,128], index: 2, kind: input, shape index: {}]   ;;  %s945_s3 = inlined_call_operand.vmem [shape: f32[1,128], index: 3, kind: input, shape index: {}]   ;;  %s946_s4 = inlined_call_operand.vmem [shape: f32[1,128], index: 4, kind: input, shape index: {}]   ;;  %s947_s5 = inlined_call_operand.hbm [shape: bf16[128,128], index: 5, kind: input, shape index: {}]   ;;  %s948_s6 = inlined_call_operand.vmem [shape: f32[1,128], index: 6, kind: input, shape index: {}]   ;;  %s949_s7 = inlined_call_operand.vmem [shape: f32[1,128], index: 7, kind: input, shape index: {}]   ;;  %s950_s8 = inlined_call_operand.vmem [shape: f32[1,128], index: 8, kind: input, shape index: {}]   ;;  %s951_s9 = inlined_call_operand.hbm [shape: bf16[128,128], index: 9, kind: input, shape index: {}]   ;;  %s952_s10 = inlined_call_operand.vmem [shape: f32[1,128], index: 10, kind: input, shape index: {}]   ;;  %s953_s11 = inlined_call_operand.hbm [shape: f32[8,128], index: 11, kind: output, shape index: {}]  }
   0x1   :  { %17 = vsyncpa [#allocation6], 0 }
   0x2   :  { %18 = vsyncpa [#allocation4], 0  ;;  %s753_s17 = smov [#allocation5]   ;;  %s754_s19 = smov [#allocation2]  }
   0x3   :  { %s44_s18 = sshll.u32 %s753_s17, 4  ;;  %s26_s20 = sshll.u32 %s754_s19, 4  ;;  %s45_s18 = int_to_ptr.vmem [resolvable:$true] %s44_s18  ;;  %s821_s20 = int_to_ptr.vmem [resolvable:$true] %s26_s20 }
   0x4   :  { %s659_s23 = scalar_lea.hbm %s947_s5, 1024 }
   0x5   :  { %p660_p0 = scmp.ne.s32.totalorder %s947_s5, %s659_s23  ;;  %p663_p1 = scmp.lt.u32.totalorder %s659_s23, %s947_s5 }
   0x7   :  { %p665_p2 = pnand %p663_p1, %p660_p0 }
   0x9   :  { %668 = shalt.err (!%p665_p2)
}
   0xa   :  { %s669_s28 = scalar_lea.vmem %s45_s18, 1024  ;;  %p674_p4 = scmp.lt.s32.totalorder %s45_s18, %s45_s18 }
   0xb   :  { %p670_p3 = scmp.ne.s32.totalorder %s45_s18, %s669_s28  ;;  %p675_p5 = scmp.lt.s32.totalorder %s669_s28, %s669_s28 }
   0xd   :  { %p676_p6 = por %p675_p5, %p674_p4 }
   0xf   :  { %p677_p7 = pnand %p676_p6, %p670_p3 }
  0x11   :  { %680 = shalt.err (!%p677_p7)
}
  0x12   :  { %s755_s29 = smov 64   ;;  %s756_s30 = smov 4  }
  0x13   :  { %50 = dma.hbm_to_vmem [thread:$0]  %s947_s5, 1024, %s45_s18, [#allocation6], %s755_s29, %s755_s29, %s756_s30  }
  0x14   :  { %s681_s16 = scalar_lea.hbm %s943_s1, 1024 }
  0x15   :  { %p682_p8 = scmp.ne.s32.totalorder %s943_s1, %s681_s16  ;;  %p685_p9 = scmp.lt.u32.totalorder %s681_s16, %s943_s1 }
  0x17   :  { %p687_p10 = pnand %p685_p9, %p682_p8 }
  0x19   :  { %690 = shalt.err (!%p687_p10)
}
  0x1a   :  { %s691_s23 = scalar_lea.vmem %s821_s20, 1024  ;;  %p696_p12 = scmp.lt.s32.totalorder %s821_s20, %s821_s20 }
  0x1b   :  { %p692_p11 = scmp.ne.s32.totalorder %s821_s20, %s691_s23  ;;  %p697_p13 = scmp.lt.s32.totalorder %s691_s23, %s691_s23 }
  0x1d   :  { %p698_p0 = por %p697_p13, %p696_p12 }
  0x1f   :  { %p699_p1 = pnand %p698_p0, %p692_p11 }
  0x21   :  { %702 = shalt.err (!%p699_p1)
}
  0x22   :  { %32 = dma.hbm_to_vmem [thread:$0]  %s943_s1, 1024, %s821_s20, [#allocation3], %s755_s29, %s755_s29, %s756_s30  }
  0x23   :  { %s757_s24 = smov [#allocation7]   ;;  %s703_s28 = scalar_lea.hbm %s951_s9, 1024 }
  0x24   :  { %s62_s25 = sshll.u32 %s757_s24, 4  ;;  %p704_p2 = scmp.ne.s32.totalorder %s951_s9, %s703_s28  ;;  %s63_s25 = int_to_ptr.vmem [resolvable:$true] %s62_s25 }
  0x25   :  { %p707_p3 = scmp.lt.u32.totalorder %s703_s28, %s951_s9 }
  0x27   :  { %p709_p4 = pnand %p707_p3, %p704_p2 }
  0x29   :  { %712 = shalt.err (!%p709_p4)
}
  0x2a   :  { %s713_s16 = scalar_lea.vmem %s63_s25, 1024  ;;  %p718_p6 = scmp.lt.s32.totalorder %s63_s25, %s63_s25 }
  0x2b   :  { %p714_p5 = scmp.ne.s32.totalorder %s63_s25, %s713_s16  ;;  %p719_p7 = scmp.lt.s32.totalorder %s713_s16, %s713_s16 }
  0x2d   :  { %p720_p8 = por %p719_p7, %p718_p6 }
  0x2f   :  { %p721_p9 = pnand %p720_p8, %p714_p5 }
  0x31   :  { %724 = shalt.err (!%p721_p9)
}
  0x32   :  { %68 = dma.hbm_to_vmem [thread:$0]  %s951_s9, 1024, %s63_s25, [#allocation6], %s755_s29, %s755_s29, %s756_s30  }
  0x33   :  { %747 = dma.done.wait [#allocation3], 1024  }
  0x34   :  { %748 = vsyncadd [#allocation3], 4294966272 }
  0x35   :  { %749 = dma.done.wait [#allocation6], 2048  }
  0x36   :  { %750 = vsyncadd [#allocation6], 4294965248  ;;  %v758_v0 = vmov 0.0   ;;  %vm759_vm0 = vmmov 0   ;;  %v631_v1 = vld [vmem:[#allocation2] sm:$0xff]   ;;  %v632_v2 = vld [vmem:[#allocation2 + $0x8] sm:$0xff]   ;;  %v216_v42 = vlaneseq }
  0x37   :  { %563 = vmatprep.subr.bf16.mxu0 %v758_v0  ;;  %579 = vmatprep.mubr.msk.bf16.mxu0 %vm759_vm0, %v758_v0  ;;  %v633_v3 = vld [vmem:[#allocation2 + $0x10] sm:$0xff]   ;;  %v634_v4 = vld [vmem:[#allocation2 + $0x18] sm:$0xff]   ;;  %v635_v5 = vld [vmem:[#allocation2 + $0x20] sm:$0xff]   ;;  %s760_s25 = smov [#allocation8]  }
  0x38   :  { %583 = vmatprep.subr.bf16.mxu1 %v758_v0  ;;  %599 = vmatprep.mubr.msk.bf16.mxu1 %vm759_vm0, %v758_v0  ;;  %v636_v6 = vld [vmem:[#allocation2 + $0x28] sm:$0xff]   ;;  %v637_v7 = vld [vmem:[#allocation2 + $0x30] sm:$0xff]   ;;  %v638_v8 = vld [vmem:[#allocation2 + $0x38] sm:$0xff]   ;;  %v902_v43 = vshrl.u32 %v216_v42, 7  ;;  %s497_s26 = sshll.u32 %s760_s25, 4  ;;  %s498_s26 = int_to_ptr.vmem [resolvable:$true] %s497_s26 }
  0x39   :  { %564 = vmatpush3.bf16.msra.mxu0 %v631_v1  ;;  %v81_v9 = vld [vmem:[%s942_s0] sm:$0xf]  ;;  %v640_v11 = vld [vmem:[#allocation5 + $0x8] sm:$0xff]   ;;  %v641_v12 = vld [vmem:[#allocation5 + $0x10] sm:$0xff]   ;;  %p730_p11 = scmp.lt.s32.totalorder %s498_s26, %s498_s26 }
  0x3a   :  { %565 = vmatprep.subr.bf16.mxu0 %v758_v0  ;;  %v639_v10 = vld [vmem:[#allocation5] sm:$0xff]   ;;  %v642_v13 = vld [vmem:[#allocation5 + $0x18] sm:$0xff]   ;;  %v644_v15 = vld [vmem:[#allocation5 + $0x28] sm:$0xff]   ;;  %v218_v45 = vsub.s32 0, %v902_v43 }
  0x3b   :  { %584 = vmatpush3.bf16.msra.mxu1 %v639_v10  ;;  %v643_v14 = vld [vmem:[#allocation5 + $0x20] sm:$0xff]   ;;  %v645_v16 = vld [vmem:[#allocation5 + $0x30] sm:$0xff]   ;;  %v646_v17 = vld [vmem:[#allocation5 + $0x38] sm:$0xff]  }
  0x3c   :  { %585 = vmatprep.subr.bf16.mxu1 %v758_v0  ;;  %v507_v18 = vld [vmem:[%s944_s2] ss:$0 sm:$0xff]  ;;  %v648_v54 = vld [vmem:[#allocation7 + $0x8] sm:$0xff]   ;;  %v649_v55 = vld [vmem:[#allocation7 + $0x10] sm:$0xff]  }
  0x3d   :  { %566 = vmatpush3.bf16.msra.mxu0 %v632_v2  ;;  %v211_v44 = vld [vmem:[%s945_s3] sm:$0x1]  ;;  %v650_v56 = vld [vmem:[#allocation7 + $0x18] sm:$0xff]   ;;  %v652_v58 = vld [vmem:[#allocation7 + $0x28] sm:$0xff]  }
  0x3e   :  { %567 = vmatprep.subr.bf16.mxu0 %v758_v0  ;;  %v516_v49 = vld [vmem:[%s946_s4] ss:$0 sm:$0xff]  ;;  %v653_v59 = vld [vmem:[#allocation7 + $0x30] sm:$0xff]   ;;  %v654_v60 = vld [vmem:[#allocation7 + $0x38] sm:$0xff]  }
  0x3f   :  { %586 = vmatpush3.bf16.msra.mxu1 %v640_v11  ;;  %v647_v53 = vld [vmem:[#allocation7] sm:$0xff]  }
  0x40   :  { %587 = vmatprep.subr.bf16.mxu1 %v758_v0  ;;  %v651_v57 = vld [vmem:[#allocation7 + $0x20] sm:$0xff]  }
  0x41   :  { %568 = vmatpush3.bf16.msra.mxu0 %v633_v3  ;;  %v517_v61 = vld [vmem:[%s948_s6] ss:$0 sm:$0xff] }
  0x42   :  { %569 = vmatprep.subr.bf16.mxu0 %v758_v0 }
  0x43   :  { %588 = vmatpush3.bf16.msra.mxu1 %v641_v12 }
  0x44   :  { %589 = vmatprep.subr.bf16.mxu1 %v758_v0 }
  0x45   :  { %570 = vmatpush3.bf16.msra.mxu0 %v634_v4 }
  0x46   :  { %571 = vmatprep.subr.bf16.mxu0 %v758_v0 }
  0x47   :  { %590 = vmatpush3.bf16.msra.mxu1 %v642_v13 }
  0x48   :  { %591 = vmatprep.subr.bf16.mxu1 %v758_v0 }
  0x49   :  { %572 = vmatpush3.bf16.msra.mxu0 %v635_v5 }
  0x4a   :  { %573 = vmatprep.subr.bf16.mxu0 %v758_v0 }
  0x4b   :  { %592 = vmatpush3.bf16.msra.mxu1 %v643_v14 }
  0x4c   :  { %593 = vmatprep.subr.bf16.mxu1 %v758_v0 }
  0x4d   :  { %574 = vmatpush3.bf16.msra.mxu0 %v636_v6 }
  0x4e   :  { %575 = vmatprep.subr.bf16.mxu0 %v758_v0 }
  0x4f   :  { %594 = vmatpush3.bf16.msra.mxu1 %v644_v15 }
  0x50   :  { %595 = vmatprep.subr.bf16.mxu1 %v758_v0 }
  0x51   :  { %576 = vmatpush3.bf16.msra.mxu0 %v637_v7 }
  0x52   :  { %577 = vmatprep.subr.bf16.mxu0 %v758_v0 }
  0x53   :  { %596 = vmatpush3.bf16.msra.mxu1 %v645_v16 }
  0x54   :  { %597 = vmatprep.subr.bf16.mxu1 %v758_v0 }
  0x55   :  { %578 = vmatpush3.bf16.msra.mxu0 %v638_v8 }
  0x56   :  { %603 = vmatprep.subr.bf16.mxu0 %v758_v0 }
  0x57   :  { %598 = vmatpush3.bf16.msra.mxu1 %v646_v17 }
  0x58   :  { %580 = vmatmul.mubr.bf16.vlgmr.msra.gmra.mrb[0].mxu0 %v81_v9 }
  0x59   :  { %619 = vmatprep.mubr.msk.bf16.mxu0 %vm759_vm0, %v758_v0  ;;  %604 = vmatpush3.bf16.msra.mxu0 %v647_v53 }
  0x5a   :  { %605 = vmatprep.subr.bf16.mxu0 %v758_v0 }
  0x5d   :  { %606 = vmatpush3.bf16.msra.mxu0 %v648_v54 }
  0x5e   :  { %607 = vmatprep.subr.bf16.mxu0 %v758_v0 }
  0x61   :  { %608 = vmatpush3.bf16.msra.mxu0 %v649_v55 }
  0x62   :  { %609 = vmatprep.subr.bf16.mxu0 %v758_v0 }
  0x65   :  { %610 = vmatpush3.bf16.msra.mxu0 %v650_v56 }
  0x66   :  { %611 = vmatprep.subr.bf16.mxu0 %v758_v0 }
  0x69   :  { %612 = vmatpush3.bf16.msra.mxu0 %v651_v57 }
  0x6a   :  { %613 = vmatprep.subr.bf16.mxu0 %v758_v0 }
  0x6d   :  { %614 = vmatpush3.bf16.msra.mxu0 %v652_v58 }
  0x6e   :  { %615 = vmatprep.subr.bf16.mxu0 %v758_v0 }
  0x71   :  { %616 = vmatpush3.bf16.msra.mxu0 %v653_v59 }
  0x72   :  { %617 = vmatprep.subr.bf16.mxu0 %v758_v0 }
  0x75   :  { %618 = vmatpush3.bf16.msra.mxu0 %v654_v60 }
 0x12b   :  { %v187_v19 = vpop.f32.mrb[0].mxu0 }
 0x12c   :  { %v188_v20 = vadd.f32 %v507_v18, %v187_v19  ;;  %v581_v21 = vpop.f32.mrb[1].mxu0 }
 0x12d   :  { %v190_v22 = vpop.f32.mrb[2].mxu0  ;;  %v359_v21 = vld [vmem:[%s949_s7] sm:$0x1]  ;;  %s725_s7 = scalar_lea.vmem %s498_s26, 128 }
 0x12e   :  { %v193_v23 = vmax.f32 %v188_v20, 0.0  ;;  %v582_v24 = vpop.f32.mrb[3].mxu0  ;;  %p726_p10 = scmp.ne.s32.totalorder %s498_s26, %s725_s7  ;;  %p731_p12 = scmp.lt.s32.totalorder %s725_s7, %s725_s7 }
 0x130   :  { %v194_v25 = vrot.slane %v193_v23, 4  ;;  %p732_p13 = por %p731_p12, %p730_p11 }
 0x132   :  { %v195_v26 = vadd.f32 %v194_v25, %v193_v23  ;;  %v526_v25 = vld [vmem:[%s950_s8] ss:$0 sm:$0xff]  ;;  %p733_p0 = pnand %p732_p13, %p726_p10 }
 0x134   :  { %v196_v27 = vrot.slane %v195_v26, 2 }
 0x136   :  { %v197_v28 = vadd.f32 %v196_v27, %v195_v26 }
 0x138   :  { %v198_v29 = vrot.slane %v197_v28, 1 }
 0x13a   :  { %v199_v30 = vadd.f32 %v198_v29, %v197_v28  ;;  %v527_v29 = vld [vmem:[%s952_s10] ss:$0 sm:$0xff] }
 0x13c   :  { %v201_v31 = vmul.f32 0.125, %v199_v30 }
 0x13e   :  { %v202_v32 = vsub.f32 %v193_v23, %v201_v31 }
 0x140   :  { %v203_v33 = vmul.f32 %v202_v32, %v202_v32 }
 0x142   :  { %v204_v34 = vrot.slane %v203_v33, 4 }
 0x144   :  { %v205_v35 = vadd.f32 %v204_v34, %v203_v33 }
 0x146   :  { %v206_v36 = vrot.slane %v205_v35, 2 }
 0x148   :  { %v207_v37 = vadd.f32 %v206_v36, %v205_v35 }
 0x14a   :  { %v208_v38 = vrot.slane %v207_v37, 1 }
 0x14c   :  { %v209_v39 = vadd.f32 %v208_v38, %v207_v37 }
 0x14e   :  { %v210_v40 = vmul.f32 0.125, %v209_v39 }
 0x150   :  { %v212_v41 = vadd.f32 1e-05, %v210_v40 }
 0x152   :  { %655 = vrsqrt.f32 %v212_v41 }
 0x15c   :  { %v656_v46 = vpop.eup %655 }
 0x15d   :  { %v214_v47 = vmul.f32 %v656_v46, %v211_v44 }
 0x15f   :  { %v219_v48 = vrot.slane %v214_v47, %v218_v45 }
 0x161   :  { %v221_v50 = vmul.f32 %v219_v48, %v202_v32 }
 0x163   :  { %v229_v51 = vadd.f32 %v516_v49, %v221_v50 }
 0x165   :  { %v230_v52 = vpack.c.bf16 %v229_v51, %v229_v51 }
 0x167   :  { %600 = vmatmul.mubr.bf16.vlgmr.msra.gmra.mrb[0].mxu1 %v230_v52 }
 0x23a   :  { %v336_v62 = vpop.f32.mrb[0].mxu1 }
 0x23b   :  { %v337_v63 = vadd.f32 %v517_v61, %v336_v62  ;;  %v601_v1 = vpop.f32.mrb[1].mxu1 }
 0x23c   :  { %v339_v2 = vpop.f32.mrb[2].mxu1 }
 0x23d   :  { %v342_v3 = vmax.f32 %v337_v63, 0.0  ;;  %v602_v4 = vpop.f32.mrb[3].mxu1 }
 0x23f   :  { %v343_v5 = vrot.slane %v342_v3, 4 }
 0x241   :  { %v344_v6 = vadd.f32 %v343_v5, %v342_v3 }
 0x243   :  { %v345_v7 = vrot.slane %v344_v6, 2 }
 0x245   :  { %v346_v8 = vadd.f32 %v345_v7, %v344_v6 }
 0x247   :  { %v347_v9 = vrot.slane %v346_v8, 1 }
 0x249   :  { %v348_v10 = vadd.f32 %v347_v9, %v346_v8 }
 0x24b   :  { %v349_v11 = vmul.f32 0.125, %v348_v10 }
 0x24d   :  { %v350_v0 = vsub.f32 %v342_v3, %v349_v11 }
 0x24f   :  { %v351_v12 = vmul.f32 %v350_v0, %v350_v0 }
 0x251   :  { %v352_v13 = vrot.slane %v351_v12, 4 }
 0x253   :  { %v353_v14 = vadd.f32 %v352_v13, %v351_v12 }
 0x255   :  { %v354_v15 = vrot.slane %v353_v14, 2 }
 0x257   :  { %v355_v16 = vadd.f32 %v354_v15, %v353_v14 }
 0x259   :  { %v356_v17 = vrot.slane %v355_v16, 1 }
 0x25b   :  { %v357_v18 = vadd.f32 %v356_v17, %v355_v16 }
 0x25d   :  { %v358_v19 = vmul.f32 0.125, %v357_v18 }
 0x25f   :  { %v360_v20 = vadd.f32 1e-05, %v358_v19 }
 0x261   :  { %657 = vrsqrt.f32 %v360_v20 }
 0x26b   :  { %v658_v22 = vpop.eup %657 }
 0x26c   :  { %v362_v23 = vmul.f32 %v658_v22, %v359_v21 }
 0x26e   :  { %v367_v24 = vrot.slane %v362_v23, %v218_v45 }
 0x270   :  { %v369_v26 = vmul.f32 %v367_v24, %v350_v0 }
 0x272   :  { %v377_v27 = vadd.f32 %v526_v25, %v369_v26 }
 0x274   :  { %v378_v28 = vpack.c.bf16 %v377_v27, %v377_v27 }
 0x276   :  { %620 = vmatmul.mubr.bf16.vlgmr.msra.gmra.mrb[4].mxu0 %v378_v28 }
 0x349   :  { %v484_v30 = vpop.f32.mrb[4].mxu0 }
 0x34a   :  { %v485_v31 = vadd.f32 %v527_v29, %v484_v30  ;;  %v621_v32 = vpop.f32.mrb[5].mxu0 }
 0x34b   :  { %v487_v33 = vpop.f32.mrb[6].mxu0 }
 0x34c   :  { %490 = vst [vmem:[#allocation8] sm:$0xff] %v485_v31  ;;  %v622_v34 = vpop.f32.mrb[7].mxu0 }
 0x34d   :  { %736 = shalt.err (!%p733_p0)
}
 0x34e   :  { %s737_s10 = scalar_lea.hbm %s953_s11, 128 }
 0x34f   :  { %p738_p1 = scmp.ne.s32.totalorder %s953_s11, %s737_s10  ;;  %p741_p2 = scmp.lt.u32.totalorder %s737_s10, %s953_s11 }
 0x351   :  { %p743_p3 = pnand %p741_p2, %p738_p1 }
 0x353   :  { %746 = shalt.err (!%p743_p3)
}
 0x354   :  { %500 = dma.vmem_to_hbm [thread:$0]  %s498_s26, 128, %s953_s11, [#allocation4]  }
 0x355   :  { %751 = dma.done.wait [#allocation4], 128  }
 0x356   :  { %752 = vsyncadd [#allocation4], 4294967168 }
 0x357   :  { %504 = vsyncpa [#allocation3], 1 }
 0x358   :  { %505 = vsyncpa [#allocation6], 1 }
 0x359   :  { %506 = vsyncpa [#allocation4], 1 }

</bundles_post_ra>
